<compile_context>
chip_gen: v7x
topology: tpu7x:2x2x1
jax: 0.10.0
libtpu: 0.0.40
codegen_flags: <defaults>
</compile_context>

<pallas_src>
import functools

import jax
import jax.numpy as jnp
from jax import lax
from jax.experimental import pallas as pl
from jax.experimental.pallas import tpu as pltpu


# ---------------------------------------------------------------------------
# Main kernel: LayerNorm (no affine) + modulate + final projection
# ---------------------------------------------------------------------------
def _ln_mod_proj_kernel(shift_ref, scale1_ref, x_ref, w_ref, b_ref, o_ref,
                        *, eps, compute_dtype):
    # ---- LayerNorm in f32 (eps inside the sqrt, PyTorch semantics) ----
    x = x_ref[0].astype(jnp.float32)                          # (tile_n, H)
    mean = jnp.mean(x, axis=-1, keepdims=True)
    xc = x - mean
    var = jnp.mean(xc * xc, axis=-1, keepdims=True)
    xn = xc * lax.rsqrt(var + eps)                            # (tile_n, H)

    # ---- modulate with the precomputed per-batch (1, H) rows ----
    mod = (xn * scale1_ref[0].astype(jnp.float32)
           + shift_ref[0].astype(jnp.float32))                # (tile_n, H)

    # ---- final projection on the MXU, f32 accumulation ----
    out = jnp.dot(mod.astype(compute_dtype),
                  w_ref[...].astype(compute_dtype),
                  preferred_element_type=jnp.float32)         # (tile_n, D)
    o_ref[0] = (out + b_ref[...].astype(jnp.float32)).astype(o_ref.dtype)


# ---------------------------------------------------------------------------
# Tile-size heuristic: kernel is HBM-read bound, so pick the biggest sequence
# tile that (a) is legal (multiple of 8 or full dim), (b) keeps the grid
# shardable across 2 TensorCores (v7x), (c) doesn't waste pad rows.
# ---------------------------------------------------------------------------
def _pick_tile_n(N, B):
    if N <= 512:
        return N                                  # full dim => always legal
    if N % 1024 == 0 and B * (N // 1024) >= 2:
        return 1024                               # v7x-friendly big tile
    return 512


# ---------------------------------------------------------------------------
# Wrapper
# ---------------------------------------------------------------------------
def decoder_layer(x, t, w_ada, b_ada, w_lin, b_lin, *, eps=1e-6):
    """x: (B, N, H), t: (B, H), w_ada: (H, 2H), b_ada: (2H,),
       w_lin: (H, D), b_lin: (D,)."""
    B, N, H = x.shape
    D = w_lin.shape[1]

    # --- Stage 1 (plain XLA): adaLN params, computed once per batch row.
    #     Tiny GEMM (B rows) -> MXU would be idle; keeps W_ada out of the
    #     Pallas VMEM budget entirely (v5e hazard in the previous version).
    t32 = t.astype(jnp.float32)
    ada = (jax.nn.silu(t32) @ w_ada.astype(jnp.float32)
           + b_ada.astype(jnp.float32))                       # (B, 2H)
    shift = ada[:, :H].reshape(B, 1, H)                       # (B, 1, H)
    scale1 = (ada[:, H:] + 1.0).reshape(B, 1, H)              # 1 + scale

    # --- Sequence tiling ---
    tile_n = _pick_tile_n(N, B)
    grid_n = pl.cdiv(N, tile_n)

    # bf16 MXU operands when either x or the projection weights are bf16
    # (halves the dominant x HBM read); f32 accumulation always.
    compute_dtype = (jnp.bfloat16
                     if (x.dtype == jnp.bfloat16 or w_lin.dtype == jnp.bfloat16)
                     else jnp.float32)

    # --- Scoped-VMEM limit sized from the actual (double-buffered) blocks,
    #     plus headroom for the in-kernel f32 LN/modulate temporaries.
    x_item = jnp.dtype(x.dtype).itemsize
    w_item = jnp.dtype(w_lin.dtype).itemsize
    vmem_needed = 2 * (tile_n * H * x_item            # x tile
                       + tile_n * D * x_item          # out tile
                       + H * D * w_item               # W_lin (resident)
                       + (2 * H + D) * 4)             # shift / scale1 / bias
    vmem_needed += 6 * tile_n * H * 4                 # f32 temporaries
    vmem_limit = int(min(64 * 1024 * 1024,
                         max(32 * 1024 * 1024, 2 * vmem_needed)))

    kernel = functools.partial(_ln_mod_proj_kernel, eps=eps,
                               compute_dtype=compute_dtype)

    b_lin2 = b_lin.reshape(1, D)

    # Grid order (B outer, n inner) keeps shift/scale and W_lin resident
    # across the inner sequence loop (constant block index => no re-DMA).
    out = pl.pallas_call(
        kernel,
        out_shape=jax.ShapeDtypeStruct((B, N, D), x.dtype),
        grid_spec=pltpu.PrefetchScalarGridSpec(
            num_scalar_prefetch=0,
            grid=(B, grid_n),
            in_specs=[
                pl.BlockSpec((1, 1, H), lambda b, n: (b, 0, 0)),        # shift
                pl.BlockSpec((1, 1, H), lambda b, n: (b, 0, 0)),        # 1+scale
                pl.BlockSpec((1, tile_n, H), lambda b, n: (b, n, 0)),   # x tile
                pl.BlockSpec((H, D), lambda b, n: (0, 0)),              # W_lin
                pl.BlockSpec((1, D), lambda b, n: (0, 0)),              # b_lin
            ],
            out_specs=pl.BlockSpec((1, tile_n, D), lambda b, n: (b, n, 0)),
        ),
        compiler_params=pltpu.CompilerParams(
            dimension_semantics=("parallel", "parallel"),
            vmem_limit_bytes=vmem_limit),
    )(shift, scale1, x, w_lin, b_lin2)

    return out


# ---------------------------------------------------------------------------
# Pure-JAX reference mirroring the PyTorch forward
# ---------------------------------------------------------------------------
def decoder_layer_ref(x, t, w_ada, b_ada, w_lin, b_lin, *, eps=1e-6):
    ada = jax.nn.silu(t) @ w_ada + b_ada                      # (B, 2H)
    H = t.shape[-1]
    shift, scale = ada[:, :H], ada[:, H:]
    mean = jnp.mean(x, axis=-1, keepdims=True)
    var = jnp.mean((x - mean) ** 2, axis=-1, keepdims=True)
    xn = (x - mean) / jnp.sqrt(var + eps)
    mod = xn * (1 + scale[:, None, :]) + shift[:, None, :]
    return mod @ w_lin + b_lin


if __name__ == "__main__":
    # Small shapes consistent with the module: hidden=32, decoder_hidden=64.
    B, N, H, D = 2, 8, 32, 64

    key = jax.random.PRNGKey(0)
    kx, kt, kwa, kba, kwl, kbl = jax.random.split(key, 6)

    x = jax.random.normal(kx, (B, N, H), dtype=jnp.float32)
    t = jax.random.normal(kt, (B, H), dtype=jnp.float32)

    # Deterministic parameter init (shapes per nn.Linear in __init__).
    w_ada = jax.random.normal(kwa, (H, 2 * H), dtype=jnp.float32) * 0.02
    b_ada = jax.random.normal(kba, (2 * H,), dtype=jnp.float32) * 0.02
    w_lin = jax.random.normal(kwl, (H, D), dtype=jnp.float32) * 0.02
    b_lin = jax.random.normal(kbl, (D,), dtype=jnp.float32) * 0.02

    out = decoder_layer(x, t, w_ada, b_ada, w_lin, b_lin)
    out = jax.block_until_ready(out)

    ref = decoder_layer_ref(x, t, w_ada, b_ada, w_lin, b_lin)
    assert out.shape == (B, N, D), out.shape
    # NOTE: f32 path meets 1e-5; a bf16 x / w_lin configuration would need a
    # looser (~1e-2) tolerance, as is standard for bf16 inference.
    assert jnp.allclose(out, ref, atol=1e-5, rtol=1e-5), \
        float(jnp.max(jnp.abs(out - ref)))

    print("KERNEL_OK")
</pallas_src>

<mosaic_0001>
module attributes {stable_mosaic.version = 11 : i64} {
  func.func @_ln_mod_proj_kernel(%arg0: i32, %arg1: i32, %arg2: memref<1x1x32xf32, #tpu.memory_space<vmem>>, %arg3: memref<1x1x32xf32, #tpu.memory_space<vmem>>, %arg4: memref<1x8x32xf32, #tpu.memory_space<vmem>>, %arg5: memref<32x64xf32, #tpu.memory_space<vmem>>, %arg6: memref<1x64xf32, #tpu.memory_space<vmem>>, %arg7: memref<1x8x64xf32, #tpu.memory_space<vmem>>) attributes {dimension_semantics = [#tpu.dimension_semantics<parallel>, #tpu.dimension_semantics<parallel>], iteration_bounds = array<i64: 2, 1>, scalar_prefetch = 0 : i64, scratch_operands = 0 : i64, tpu.core_type = #tpu.core_type<tc>, window_params = [{transform_indices = @transform_0, window_bounds = array<i64: 1, 1, 32>}, {transform_indices = @transform_1, window_bounds = array<i64: 1, 1, 32>}, {transform_indices = @transform_2, window_bounds = array<i64: 1, 8, 32>}, {pipeline_mode = #tpu.pipeline_mode<synchronous>, transform_indices = @transform_3, window_bounds = array<i64: 32, 64>}, {pipeline_mode = #tpu.pipeline_mode<synchronous>, transform_indices = @transform_4, window_bounds = array<i64: 1, 64>}, {transform_indices = @transform_5, window_bounds = array<i64: 1, 8, 64>}]} {
    %c0 = arith.constant 0 : index
    %c0_0 = arith.constant 0 : index
    %c0_1 = arith.constant 0 : index
    %0 = vector.load %arg4[%c0, %c0_0, %c0_1] : memref<1x8x32xf32, #tpu.memory_space<vmem>>, vector<1x8x32xf32>
    %1 = vector.shape_cast %0 : vector<1x8x32xf32> to vector<8x32xf32>
    %cst = arith.constant dense<0.000000e+00> : vector<8xf32>
    %2 = vector.multi_reduction <add>, %1, %cst [1] : vector<8x32xf32> to vector<8xf32>
    %3 = vector.shape_cast %2 : vector<8xf32> to vector<8x1xf32>
    %cst_2 = arith.constant 3.200000e+01 : f32
    %4 = vector.broadcast %cst_2 : f32 to vector<8x1xf32>
    %5 = arith.divf %3, %4 : vector<8x1xf32>
    %6 = vector.broadcast %5 : vector<8x1xf32> to vector<8x32xf32>
    %7 = arith.subf %1, %6 : vector<8x32xf32>
    %8 = arith.mulf %7, %7 : vector<8x32xf32>
    %cst_3 = arith.constant dense<0.000000e+00> : vector<8xf32>
    %9 = vector.multi_reduction <add>, %8, %cst_3 [1] : vector<8x32xf32> to vector<8xf32>
    %10 = vector.shape_cast %9 : vector<8xf32> to vector<8x1xf32>
    %cst_4 = arith.constant 3.200000e+01 : f32
    %11 = vector.broadcast %cst_4 : f32 to vector<8x1xf32>
    %12 = arith.divf %10, %11 : vector<8x1xf32>
    %cst_5 = arith.constant 9.99999997E-7 : f32
    %13 = vector.broadcast %cst_5 : f32 to vector<8x1xf32>
    %14 = arith.addf %12, %13 : vector<8x1xf32>
    %15 = math.rsqrt %14 : vector<8x1xf32>
    %16 = vector.broadcast %15 : vector<8x1xf32> to vector<8x32xf32>
    %17 = arith.mulf %7, %16 : vector<8x32xf32>
    %c0_6 = arith.constant 0 : index
    %c0_7 = arith.constant 0 : index
    %c0_8 = arith.constant 0 : index
    %18 = vector.load %arg3[%c0_6, %c0_7, %c0_8] : memref<1x1x32xf32, #tpu.memory_space<vmem>>, vector<1x1x32xf32>
    %19 = vector.shape_cast %18 : vector<1x1x32xf32> to vector<1x32xf32>
    %20 = vector.broadcast %19 : vector<1x32xf32> to vector<8x32xf32>
    %21 = arith.mulf %17, %20 : vector<8x32xf32>
    %c0_9 = arith.constant 0 : index
    %c0_10 = arith.constant 0 : index
    %c0_11 = arith.constant 0 : index
    %22 = vector.load %arg2[%c0_9, %c0_10, %c0_11] : memref<1x1x32xf32, #tpu.memory_space<vmem>>, vector<1x1x32xf32>
    %23 = vector.shape_cast %22 : vector<1x1x32xf32> to vector<1x32xf32>
    %24 = vector.broadcast %23 : vector<1x32xf32> to vector<8x32xf32>
    %25 = arith.addf %21, %24 : vector<8x32xf32>
    %c0_12 = arith.constant 0 : index
    %c0_13 = arith.constant 0 : index
    %26 = vector.load %arg5[%c0_12, %c0_13] : memref<32x64xf32, #tpu.memory_space<vmem>>, vector<32x64xf32>
    %cst_14 = arith.constant dense<0.000000e+00> : vector<8x64xf32>
    %27 = tpu.matmul %25, %26, %cst_14 {dimension_numbers = #tpu.dot_dimension_numbers<[1], [0], [0], [1], [0, 0, 1, 1], [], []>} : vector<8x32xf32>, vector<32x64xf32>, vector<8x64xf32> -> vector<8x64xf32>
    %c0_15 = arith.constant 0 : index
    %c0_16 = arith.constant 0 : index
    %28 = vector.load %arg6[%c0_15, %c0_16] : memref<1x64xf32, #tpu.memory_space<vmem>>, vector<1x64xf32>
    %29 = vector.broadcast %28 : vector<1x64xf32> to vector<8x64xf32>
    %30 = arith.addf %27, %29 : vector<8x64xf32>
    %c0_17 = arith.constant 0 : index
    %c0_18 = arith.constant 0 : index
    %c0_19 = arith.constant 0 : index
    %31 = vector.load %arg7[%c0_17, %c0_18, %c0_19] : memref<1x8x64xf32, #tpu.memory_space<vmem>>, vector<1x8x64xf32>
    %32 = vector.shape_cast %31 : vector<1x8x64xf32> to vector<8x64xf32>
    %33 = vector.shape_cast %30 : vector<8x64xf32> to vector<1x8x64xf32>
    tpu.vector_store %arg7[%c0_17, %c0_18, %c0_19], %33 {strides = array<i32>} : memref<1x8x64xf32, #tpu.memory_space<vmem>>, vector<1x8x64xf32>,
    return
  }
  func.func @transform_0(%arg0: i32, %arg1: i32) -> (i32, i32, i32) {
    %c0_i32 = arith.constant 0 : i32
    %c0_i32_0 = arith.constant 0 : i32
    %c0_i32_1 = arith.constant 0 : i32
    return %arg0, %c0_i32, %c0_i32_0 : i32, i32, i32
  }
  func.func @transform_1(%arg0: i32, %arg1: i32) -> (i32, i32, i32) {
    %c0_i32 = arith.constant 0 : i32
    %c0_i32_0 = arith.constant 0 : i32
    %c0_i32_1 = arith.constant 0 : i32
    return %arg0, %c0_i32, %c0_i32_0 : i32, i32, i32
  }
  func.func @transform_2(%arg0: i32, %arg1: i32) -> (i32, i32, i32) {
    %c0_i32 = arith.constant 0 : i32
    %c0_i32_0 = arith.constant 0 : i32
    return %arg0, %arg1, %c0_i32 : i32, i32, i32
  }
  func.func @transform_3(%arg0: i32, %arg1: i32) -> (i32, i32) {
    %c0_i32 = arith.constant 0 : i32
    %c0_i32_0 = arith.constant 0 : i32
    %c0_i32_1 = arith.constant 0 : i32
    return %c0_i32, %c0_i32_0 : i32, i32
  }
  func.func @transform_4(%arg0: i32, %arg1: i32) -> (i32, i32) {
    %c0_i32 = arith.constant 0 : i32
    %c0_i32_0 = arith.constant 0 : i32
    %c0_i32_1 = arith.constant 0 : i32
    return %c0_i32, %c0_i32_0 : i32, i32
  }
  func.func @transform_5(%arg0: i32, %arg1: i32) -> (i32, i32, i32) {
    %c0_i32 = arith.constant 0 : i32
    %c0_i32_0 = arith.constant 0 : i32
    return %arg0, %arg1, %c0_i32 : i32, i32, i32
  }
}

</mosaic_0001>

<bundles_post_ra>
// kernel: tpu_custom_call.1
= control target key start
LH: loop header
LB: loop body
LE: loop exit
PB: predicated region body
PF: predicated region fallthrough
CT: control target
= control target key end

     0   :  { %s1178_s0 = inlined_call_operand.hbm [shape: f32[2,1,32], index: 0, kind: input, shape index: {}]   ;;  %s1179_s1 = inlined_call_operand.vmem [shape: f32[2,1,32], index: 1, kind: input, shape index: {}]   ;;  %s1180_s2 = inlined_call_operand.hbm [shape: f32[2,8,32], index: 2, kind: input, shape index: {}]   ;;  %s1181_s3 = inlined_call_operand.hbm [shape: f32[32,64], index: 3, kind: input, shape index: {}]   ;;  %s1182_s4 = inlined_call_operand.vmem [shape: f32[1,64], index: 4, kind: input, shape index: {}]   ;;  %s1183_s5 = inlined_call_operand.hbm [shape: f32[2,8,64], index: 5, kind: output, shape index: {}]  }
   0x1   :  { %1189 = sst [smem:[#allocation14_spill]] %s1178_s0 }
   0x2   :  { %1190 = sst [smem:[#allocation15_spill]] %s1181_s3 }
   0x3   :  { %10 = vsyncpa [#allocation3], 0 }
   0x4   :  { %12 = vsyncpa [#allocation3 + $0x1], 0 }
   0x5   :  { %13 = vsyncpa [#allocation6], 0 }
   0x6   :  { %15 = vsyncpa [#allocation6 + $0x1], 0 }
   0x7   :  { %16 = vsyncpa [#allocation4], 0 }
   0x8   :  { %18 = vsyncpa [#allocation4 + $0x1], 0  ;;  %s916_s18 = smov 0   ;;  %s918_s19 = smov 0  }
   0x9   :  { %s920_s20 = smov 0   ;;  %s922_s21 = smov 0  }
   0xa   :  { %s924_s22 = smov 0   ;;  %s926_s23 = smov 0  }
   0xb LB: > { %s947_s24 = sadd.s32 4294967295, %s875_s23   ;;  %s571_s25 = sadd.s32 4294967294, %s875_s23   ;;  %s875_s23 = sphi %s926_s23, %s24_s23   ;;  %s871_s22 = sphi %s924_s22, %s1214_s22   ;;  %s867_s21 = sphi %s922_s21, %s1213_s21   ;;  %s863_s20 = sphi %s920_s20, %s1212_s20   ;;  %s859_s19 = sphi %s918_s19, %s1211_s19   ;;  %s855_s18 = sphi %s916_s18, %s1210_s18  }
   0xc   : > { %p56_p0 = scmp.ne.s32.totalorder %s859_s19, %s855_s18  ;;  %p1184_p1 = scmp.eq.s32.totalorder %s947_s24, 0 }
   0xd   : > { %p184_p3 = scmp.eq.s32.totalorder %s571_s25, 1  ;;  %p572_p5 = scmp.ge.s32.totalorder %s875_s23, 1 }
   0xe   : > { %p956_p4 = por %p1184_p1, %p56_p0  ;;  %p191_p7 = scmp.lt.s32.totalorder %s875_s23, 3 }
   0xf   : > { %p961_p6 = por %p184_p3, %p56_p0  ;;  %s877_s29 = smov [#allocation7]  }
  0x10   : > { %s1191_s26 = scalar_select %p956_p4, 1, 0 }
  0x11   : > { %s1192_s27 = scalar_select %p961_p6, 1, 0 }
  0x12   : > { %p966_p8 = pnand %p572_p5, %p191_p7  ;;  %s203_s30 = sshll.u32 %s877_s29, 4  ;;  %s204_s30 = int_to_ptr.vmem [resolvable:$true] %s203_s30 }
  0x13   : > { %s36_s7 = sadd.s32 1, %s871_s22  ;;  %s1195_s3 = sld [smem:[#allocation15_spill]] }
  0x14   : > { %s1193_s28 = scalar_select %p966_p8, 1, 0 }
  0x15   : > { %p622_p9 = pneg %p966_p8 }
  0x17   : > { %p975_p11 = pnand %p622_p9, %p1184_p1 }
  0x19   : > { %s697_s10 = scalar_lea.hbm %s1195_s3, 512  ;;  %p699_p13 = pneg %p975_p11 }
  0x1a   : > { %p698_p12 = scmp.ne.s32.totalorder %s1195_s3, %s697_s10  ;;  %p704_p5 = scmp.lt.u32.totalorder %s697_s10, %s1195_s3 }
  0x1c   : > { %p700_p0 = pnand %p699_p13, %p698_p12 }
  0x1e   : > { %p701_p3 = pneg %p700_p0 }
  0x20   : > { %p706_p7 = pnand %p704_p5, %p701_p3 }
  0x22   : > { %709 = shalt.err (!%p706_p7)
}
  0x23   : > { %s710_s15 = scalar_lea.vmem %s204_s30, 512  ;;  %p718_p2 = scmp.lt.s32.totalorder %s204_s30, %s204_s30 }
  0x24   : > { %p711_p9 = scmp.ne.s32.totalorder %s204_s30, %s710_s15  ;;  %p719_p6 = scmp.lt.s32.totalorder %s710_s15, %s710_s15 }
  0x26   : > { %p713_p10 = pnand %p711_p9, %p699_p13  ;;  %p720_p4 = por %p719_p6, %p718_p2 }
  0x28   : > { %p714_p1 = pneg %p713_p10 }
  0x2a   : > { %p721_p8 = pnand %p720_p4, %p714_p1 }
  0x2c   : > { %724 = shalt.err (!%p721_p8)
}
  0x2d   : > { %s878_s16 = smov 128   ;;  %s879_s17 = smov 8  }
  0x2e   : > { %625 = dma.hbm_to_vmem [thread:$0]  (!%p975_p11), %s1195_s3, 512, %s204_s30, [#allocation6], %s878_s16, %s878_s16, %s879_s17  }
  0x2f   : > { %p38_p1 = scmp.ge.s32.totalorder %s36_s7, 2  ;;  %s43_s8 = sadd.s32 1, %s863_s20 }
  0x30   : > { %p50_p2 = scmp.ne.s32.totalorder %s863_s20, %s859_s19  ;;  %p51_p4 = scmp.eq.s32.totalorder %s875_s23, 0 }
  0x31   : > { %s1216_s7 = smov (%p38_p1, %s36_s7), 0  ;;  %p1197_p8 = scmp.eq.s32.totalorder %s947_s24, 1 }
  0x32   : > { %1196 = sst [smem:[#allocation13_spill]] %s1216_s7  ;;  %p52_p6 = por %p51_p4, %p50_p2 }
  0x33   : > { %p1004_p10 = por %p1197_p8, %p50_p2  ;;  %s40_s10 = ssub.s32 %s871_s22, %s1216_s7 }
  0x34   : > { %p638_p12 = scmp.lt.s32.totalorder %s875_s23, 2  ;;  %p41_p13 = scmp.eq.s32.totalorder %s40_s10, 0 }
  0x35   : > { %s1198_s9 = scalar_select %p1004_p10, 1, 0 }
  0x36   : > { %s1012_s6 = sand.u32 1, %s863_s20   ;;  %s575_s11 = sshll.u32 %s871_s22, 4 }
  0x37   : > { %s1015_s30 = scalar_select %p41_p13, %s863_s20, %s43_s8  }
  0x38   : > { %s223_s12 = scalar_lea.vmem [#allocation2], %s1012_s6  ;;  %s1199_s0 = sld [smem:[#allocation14_spill]] }
  0x39   : > { %s230_s13 = sshll.u32 %s223_s12, 4  ;;  %p1026_p11 = pnand %p638_p12, %p52_p6  ;;  %s1024_s13 = int_to_ptr.vmem [resolvable:$true] %s230_s13 }
  0x3a   : > { %s576_s29 = sshll.u32 %s1012_s6, 3  ;;  %s221_s8 = scalar_lea.sflag [#allocation3], %s1012_s6 }
  0x3b   : > { %p727_p3 = pneg %p1026_p11 }
  0x3e   : > { %s1022_s16 = scalar_lea.hbm %s1199_s0, %s575_s11  ;;  %s730_s14 = scalar_lea.hbm %s1199_s0, 32 }
  0x3f   : > { %s725_s10 = scalar_lea.hbm %s1022_s16, 16  ;;  %p731_p9 = scmp.lt.u32.totalorder %s1022_s16, %s1199_s0 }
  0x40   : > { %p726_p0 = scmp.ne.s32.totalorder %s1022_s16, %s725_s10  ;;  %p732_p1 = scmp.lt.u32.totalorder %s730_s14, %s725_s10 }
  0x41   : > { %p734_p4 = scmp.lt.u32.totalorder %s725_s10, %s1022_s16 }
  0x42   : > { %p728_p5 = pnand %p727_p3, %p726_p0  ;;  %p733_p2 = por %p732_p1, %p731_p9 }
  0x44   : > { %p729_p7 = pneg %p728_p5  ;;  %p735_p6 = por %p734_p4, %p733_p2 }
  0x46   : > { %p736_p8 = pnand %p735_p6, %p729_p7 }
  0x48   : > { %739 = shalt.err (!%p736_p8)
}
  0x49   : > { %s740_s25 = scalar_lea.vmem %s1024_s13, 16  ;;  %s880_s11 = smov [#allocation2]  }
  0x4a   : > { %p741_p12 = scmp.ne.s32.totalorder %s1024_s13, %s740_s25  ;;  %s745_s12 = sshll.u32 %s880_s11, 4  ;;  %s746_s12 = int_to_ptr.vmem [resolvable:$false] %s745_s12 }
  0x4b   : > { %s747_s3 = scalar_lea.vmem %s746_s12, 32  ;;  %p748_p5 = scmp.lt.s32.totalorder %s1024_s13, %s746_s12 }
  0x4c   : > { %p743_p13 = pnand %p741_p12, %p727_p3  ;;  %p749_p9 = scmp.lt.s32.totalorder %s747_s3, %s740_s25 }
  0x4e   : > { %p744_p0 = pneg %p743_p13  ;;  %p750_p1 = por %p749_p9, %p748_p5 }
  0x50   : > { %p751_p2 = pnand %p750_p1, %p744_p0 }
  0x52   : > { %754 = shalt.err (!%p751_p2)
}
  0x53   : > { %629 = dma.hbm_to_vmem [thread:$0]  (!%p1026_p11), %s1022_s16, 16, %s1024_s13, %s221_s8  }
  0x54   : > { %s577_s10 = sshll.u32 %s871_s22, 7  ;;  %s247_s14 = scalar_lea.vmem [#allocation5], %s576_s29 }
  0x55   : > { %s255_s15 = sshll.u32 %s247_s14, 4  ;;  %s1064_s25 = scalar_lea.hbm %s1180_s2, %s577_s10  ;;  %s256_s15 = int_to_ptr.vmem [resolvable:$true] %s255_s15 }
  0x56   : > { %s1201_s12 = sand.u32 1, %s875_s23   ;;  %s755_s7 = scalar_lea.hbm %s1064_s25, 128 }
  0x57   : > { %s244_s3 = scalar_lea.sflag [#allocation6], %s1201_s12  ;;  %p756_p7 = scmp.ne.s32.totalorder %s1064_s25, %s755_s7 }
  0x58   : > { %s760_s16 = scalar_lea.hbm %s1180_s2, 256  ;;  %p761_p8 = scmp.lt.u32.totalorder %s1064_s25, %s1180_s2 }
  0x59   : > { %p758_p4 = pnand %p756_p7, %p727_p3  ;;  %p762_p12 = scmp.lt.u32.totalorder %s760_s16, %s755_s7 }
  0x5a   : > { %p764_p0 = scmp.lt.u32.totalorder %s755_s7, %s1064_s25 }
  0x5b   : > { %p759_p6 = pneg %p758_p4  ;;  %p763_p13 = por %p762_p12, %p761_p8 }
  0x5d   : > { %p765_p5 = por %p764_p0, %p763_p13 }
  0x5f   : > { %p766_p9 = pnand %p765_p5, %p759_p6 }
  0x61   : > { %769 = shalt.err (!%p766_p9)
}
  0x62   : > { %s770_s8 = scalar_lea.vmem %s256_s15, 128  ;;  %s881_s10 = smov [#allocation5]  }
  0x63   : > { %p771_p1 = scmp.ne.s32.totalorder %s256_s15, %s770_s8  ;;  %s775_s14 = sshll.u32 %s881_s10, 4  ;;  %s776_s14 = int_to_ptr.vmem [resolvable:$false] %s775_s14 }
  0x64   : > { %s777_s11 = scalar_lea.vmem %s776_s14, 256  ;;  %p778_p4 = scmp.lt.s32.totalorder %s256_s15, %s776_s14 }
  0x65   : > { %p773_p2 = pnand %p771_p1, %p727_p3  ;;  %p779_p10 = scmp.lt.s32.totalorder %s777_s11, %s770_s8 }
  0x67   : > { %p774_p7 = pneg %p773_p2  ;;  %p780_p8 = por %p779_p10, %p778_p4 }
  0x69   : > { %p781_p12 = pnand %p780_p8, %p774_p7 }
  0x6b   : > { %784 = shalt.err (!%p781_p12)
}
  0x6c   : > { %632 = dma.hbm_to_vmem [thread:$0]  (!%p1026_p11), %s1064_s25, 128, %s256_s15, %s244_s3  }
  0x6d   : > { %p1202_p6 = scmp.ne.s32.totalorder %s1193_s28, 0 }
  0x6e   : > { %s1090_s7 = sand.u32 (!%p1202_p6), 1, %s859_s19   ;;  %p1203_p3 = scmp.ne.s32.totalorder (!%p1202_p6), %s1191_s26, 0 }
  0x6f   : > { %264 = sbr.rel (%p1202_p6) target bundleno = 667 (0x29b), region = 40  ;;  %s267_s12 = scalar_lea.sflag (!%p1202_p6), [#allocation3], %s1090_s7 }
  0x70   : > { %s269_s6 = scalar_lea.vmem (!%p1202_p6), [#allocation2], %s1090_s7 }
  0x76   : > { %838 = dma.done.wait (%p1203_p3), %s267_s12, 16  }
  0x77   : > { %840 = vsyncadd (%p1203_p3), %s267_s12, 4294967280  ;;  %s274_s17 = sand.u32 1, %s947_s24   ;;  %s579_s28 = sshll.u32 %s1090_s7, 3 }
  0x78   : > { %s275_s15 = scalar_lea.sflag [#allocation6], %s274_s17  ;;  %s278_s25 = scalar_lea.vmem [#allocation5], %s579_s28 }
  0x79   : > { %842 = dma.done.wait (%p1203_p3), %s275_s15, 128  }
  0x7a   : > { %844 = vsyncadd (%p1203_p3), %s275_s15, 4294967168  ;;  %p1204_p10 = scmp.eq.s32.totalorder %s947_s24, 0 }
  0x7c   : > { %846 = dma.done.wait (%p1204_p10), [#allocation6], 512   ;;  %p1205_p11 = pmov %p1204_p10 }
  0x7d   : > { %vm320_vm0 = vcmask 261120   ;;  %v319_v0 = vld [vmem:[%s278_s25] sm:$0xff]  ;;  %v351_v7 = vld [vmem:[#allocation7] sm:$0xff]  ;;  %v352_v8 = vld [vmem:[#allocation7 + $0x8] sm:$0xff]  ;;  %v882_v10 = vmov 0.0|0.0   ;;  %vm883_vm1 = vmmov 0  }
  0x7e   : > { %848 = vsyncadd (%p1205_p11), [#allocation6], 4294966784  ;;  %v321_v1 = vsel %vm320_vm0, %v319_v0, 0.0  ;;  %v353_v9 = vld [vmem:[#allocation7 + $0x10] sm:$0xff]  ;;  %606 = vmatprep.subr.bf16.mxu0 %v882_v10  ;;  %v607_v11 = vpack.c.bf16 %v352_v8, %v351_v7  ;;  %v354_v12 = vld [vmem:[#allocation7 + $0x18] sm:$0xff]  ;;  %v884_v13 = vmov 0.0  }
  0x7f   : > { %322 = vadd.xlane.f32.xlu0 %v321_v1  ;;  %603 = vmatprep.mubr.msk.f32.mxu0 %vm883_vm1, %v884_v13  ;;  %v610_v14 = vpack.c.bf16 %v354_v12, %v353_v9  ;;  %p316_p13 = scmp.lt.s32.totalorder %s867_s21, 1  ;;  %v583_v21 = vld [vmem:[%s269_s6] ss:$0 sm:$0xff]  ;;  %s587_s29 = sshll.u32 %s867_s21, 7  ;;  %vm435_vm2 = vcmask 523264  }
  0x80   : > { %608 = vmatpush3.bf16.msra.mxu0 %v607_v11  ;;  %v584_v24 = vld [vmem:[%s1182_s4] ss:$0 sm:$0xff]  ;;  %s315_s8 = scalar_lea.vmem [#allocation8], %s579_s28  ;;  %s1129_s12 = scalar_lea.hbm %s1183_s5, %s587_s29 }
  0x81   : > { %609 = vmatprep.subr.bf16.mxu0 %v882_v10  ;;  %s317_s24 = scalar_select %p316_p13, %s867_s21, 1 }
  0x82   : > { %s452_s10 = sshll.u32 %s315_s8, 4  ;;  %s438_s6 = scalar_lea.sflag [#allocation4], %s1090_s7  ;;  %s1131_s10 = int_to_ptr.vmem [resolvable:$true] %s452_s10 }
  0x83   : > { %s318_s13 = scalar_lea.vmem %s1179_s1, %s317_s24  ;;  %s785_s21 = scalar_lea.vmem %s1131_s10, 128 }
  0x84   : > { %611 = vmatpush3.bf16.msra.mxu0 %v610_v14  ;;  %v582_v19 = vld [vmem:[%s318_s13] ss:$0 sm:$0xff]  ;;  %p786_p0 = scmp.ne.s32.totalorder %s1131_s10, %s785_s21  ;;  %p1206_p5 = scmp.ne.s32.totalorder %s1198_s9, 0 }
  0x85   : > { %s885_s17 = smov [#allocation8]  }
  0x86   : > { %p787_p9 = pnand %p786_p0, %p1206_p5  ;;  %s789_s28 = sshll.u32 %s885_s17, 4  ;;  %s790_s28 = int_to_ptr.vmem [resolvable:$false] %s789_s28 }
  0x87   : > { %s791_s15 = scalar_lea.vmem %s790_s28, 256  ;;  %p792_p2 = scmp.lt.s32.totalorder %s1131_s10, %s790_s28 }
  0x88   : > { %p788_p1 = pneg %p787_p9  ;;  %p793_p7 = scmp.lt.s32.totalorder %s791_s15, %s785_s21 }
  0x8a   : > { %p794_p4 = por %p793_p7, %p792_p2 }
  0x8c   : > { %p795_p8 = pnand %p794_p4, %p788_p1 }
 0x10c   : > { %v323_v2 = vpop.xlane.xlu0 %322 }
 0x10d   : > { %v325_v3 = vmul.f32 0.03125, %v323_v2 }
 0x10f   : > { %v326_v4 = vsub.f32 %v319_v0, %v325_v3 }
 0x111   : > { %v327_v5 = vmul.f32 %v326_v4, %v326_v4 }
 0x113   : > { %v328_v6 = vsel %vm320_vm0, %v327_v5, 0.0 }
 0x114   : > { %329 = vadd.xlane.f32.xlu0 %v328_v6 }
 0x1a1   : > { %v330_v15 = vpop.xlane.xlu0 %329 }
 0x1a2   : > { %v331_v16 = vmul.f32 0.03125, %v330_v15 }
 0x1a4   : > { %v332_v17 = vadd.f32 1e-06, %v331_v16 }
 0x1a6   : > { %695 = vrsqrt.f32 %v332_v17 }
 0x1b0   : > { %v696_v18 = vpop.eup %695 }
 0x1b1   : > { %v334_v20 = vmul.f32 %v696_v18, %v326_v4 }
 0x1b3   : > { %v342_v22 = vmul.f32 %v582_v19, %v334_v20 }
 0x1b5   : > { %v350_v23 = vadd.f32 %v583_v21, %v342_v22 }
 0x1b7   : > { %604 = vmatmul.mubr.msk.f32.vlgmr.msra.gmra.mrb[0].mxu0 %vm320_vm0, %v350_v23 }
 0x28a   : > { %v431_v25 = vpop.f32.mrb[0].mxu0 }
 0x28b   : > { %v432_v26 = vadd.f32 %v584_v24, %v431_v25  ;;  %v605_v27 = vpop.f32.mrb[1].mxu0 }
 0x28d   : > { %436 = vst.msk [vmem:[%s315_s8] sm:$0xff] %vm435_vm2, %v432_v26 }
 0x28e   : > { %798 = shalt.err (!%p795_p8)
}
 0x28f   : > { %s799_s7 = scalar_lea.hbm %s1129_s12, 128  ;;  %s803_s26 = scalar_lea.hbm %s1183_s5, 256 }
 0x290   : > { %p800_p12 = scmp.ne.s32.totalorder %s1129_s12, %s799_s7  ;;  %p804_p10 = scmp.lt.u32.totalorder %s1129_s12, %s1183_s5 }
 0x291   : > { %p805_p11 = scmp.lt.u32.totalorder %s803_s26, %s799_s7  ;;  %p807_p0 = scmp.lt.u32.totalorder %s799_s7, %s1129_s12 }
 0x292   : > { %p801_p6 = pnand %p800_p12, %p1206_p5 }
 0x293   : > { %p806_p13 = por %p805_p11, %p804_p10 }
 0x294   : > { %p802_p3 = pneg %p801_p6 }
 0x295   : > { %p808_p9 = por %p807_p0, %p806_p13 }
 0x297   : > { %p809_p1 = pnand %p808_p9, %p802_p3 }
 0x299   : > { %812 = shalt.err (!%p809_p1)
}
 0x29a   : > { %620 = dma.vmem_to_hbm [thread:$0]  (%p1206_p5), %s1131_s10, 128, %s1129_s12, %s438_s6  }
 0x29b PF: > { %s464_s16 = sand.u32 1, %s855_s18   ;;  %p1207_p2 = scmp.ne.s32.totalorder %s1192_s27, 0 }
 0x29c   : > { %p1208_p7 = scmp.ge.s32.totalorder %s875_s23, 2  ;;  %s465_s0 = scalar_lea.sflag [#allocation4], %s464_s16 }
 0x29e   : > { %p634_p4 = pnand %p1208_p7, %p1207_p2 }
 0x2a0   : > { %850 = dma.done.wait (!%p634_p4), %s465_s0, 128  }
 0x2a1   : > { %852 = vsyncadd (!%p634_p4), %s465_s0, 4294967168  ;;  %s24_s23 = sadd.s32 1, %s875_s23   ;;  %s1209_s9 = sld [smem:[#allocation13_spill]] }
 0x2a2   : > { %p21_p8 = scmp.ge.s32.totalorder %s24_s23, 4   ;;  %s1210_s18 = smov %s859_s19 }
 0x2a3   : > { %s1211_s19 = smov %s863_s20  ;;  %s1212_s20 = smov %s1015_s30 }
 0x2a4   : > { %s1213_s21 = smov %s871_s22  ;;  %23 = sbr.rel (!%p21_p8) target bundleno = 11 (0xb), region = 105 }
 0x2a7   : > { %s1214_s22 = smov %s1209_s9 }
 0x2ab   :  { %470 = vsyncpa [#allocation3], 1 }
 0x2ac   :  { %472 = vsyncpa [#allocation3 + $0x1], 1 }
 0x2ad   :  { %473 = vsyncpa [#allocation6], 1 }
 0x2ae   :  { %475 = vsyncpa [#allocation6 + $0x1], 1 }
 0x2af   :  { %476 = vsyncpa [#allocation4], 1 }
 0x2b0   :  { %478 = vsyncpa [#allocation4 + $0x1], 1 }

</bundles_post_ra>
